<compile_context>
chip_gen: v6e
topology: v6e:2x2x1
jax: 0.10.0
libtpu: 0.0.40
codegen_flags: <defaults>
</compile_context>

<pallas_src>
import jax
import jax.numpy as jnp
from jax.experimental import pallas as pl
from jax.experimental.pallas import tpu as pltpu

EPS = 1e-5  # BatchNorm2d default


def conv_bn_kernel(x1_ref, x2_ref, w_ref, gamma_ref, beta_ref, o_ref):
    # x1_ref, x2_ref: (Cin, M)   VMEM, M on the lane axis
    # w_ref:          (Cout, Cin) VMEM
    # gamma_ref:      (Cout, 1)   VMEM
    # beta_ref:       (Cout, 1)   VMEM
    # o_ref:          (2*Cout, M) VMEM  (rows 0..Cout-1 = input 1, rest = input 2)
    cin, m = x1_ref.shape
    cout = w_ref.shape[0]
    inv_m = 1.0 / float(m)

    def conv1x1(x_ref):
        # (Cout, M) via Cin broadcast-FMAs: (Cout,1) weight col * (1,M) row.
        y = w_ref[:, 0:1] * x_ref[0:1, :]
        for k in range(1, cin):                      # static unroll, Cin = 2
            y = y + w_ref[:, k:k + 1] * x_ref[k:k + 1, :]
        return y

    # Both inputs' conv outputs in one lane-dense block: (2*Cout, M).
    y = jnp.concatenate([conv1x1(x1_ref), conv1x1(x2_ref)], axis=0)

    # Fused BN stats: a single lane-axis reduce over [y ; y*y] -> (4*Cout, 1).
    stats = jnp.sum(jnp.concatenate([y, y * y], axis=0),
                    axis=-1, keepdims=True)
    mean = stats[:2 * cout] * inv_m                           # (2*Cout, 1)
    var = jnp.maximum(stats[2 * cout:] * inv_m - mean * mean, 0.0)

    gamma2 = jnp.concatenate([gamma_ref[...], gamma_ref[...]], axis=0)
    beta2 = jnp.concatenate([beta_ref[...], beta_ref[...]], axis=0)
    scale = jax.lax.rsqrt(var + EPS) * gamma2                 # (2*Cout, 1)

    # Single full-block store.
    o_ref[...] = ((y - mean) * scale + beta2).astype(o_ref.dtype)


def conv_bn_pair(x1_cm, x2_cm, w, gamma, beta):
    # x1_cm, x2_cm: (Cin, M)   w: (Cout, Cin)   gamma/beta: (Cout,)
    cin, m = x1_cm.shape
    cout = w.shape[0]
    vmem = pl.BlockSpec(memory_space=pltpu.MemorySpace.VMEM)
    return pl.pallas_call(
        conv_bn_kernel,
        out_shape=jax.ShapeDtypeStruct((2 * cout, m), jnp.float32),
        in_specs=[vmem, vmem, vmem, vmem, vmem],
        out_specs=vmem,
    )(x1_cm, x2_cm, w, gamma.reshape(cout, 1), beta.reshape(cout, 1))


def model_forward(x1, x2, w, gamma, beta):
    # x1, x2: NCHW (N, Cin, H, W); w: (Cout, Cin); gamma/beta: (Cout,)
    N, Cin, H, W = x1.shape
    Cout = w.shape[0]
    M = N * H * W
    if N == 1:
        # Pure reshapes: NCHW with N=1 is already (Cin, H*W) per input, and the
        # (2*Cout, M) output flattens directly into cat((v1, v2), dim=1).
        out_cm = conv_bn_pair(x1.reshape(Cin, M), x2.reshape(Cin, M),
                              w, gamma, beta)                 # (2*Cout, M)
        return (out_cm.reshape(1, 2 * Cout, H, W),)
    # General-N fallback (not hit by the spec shapes): needs transposes.
    x1_cm = x1.transpose(1, 0, 2, 3).reshape(Cin, M)
    x2_cm = x2.transpose(1, 0, 2, 3).reshape(Cin, M)
    out_cm = conv_bn_pair(x1_cm, x2_cm, w, gamma, beta)       # (2*Cout, M)
    out = out_cm.reshape(2, Cout, N, H, W).transpose(0, 2, 1, 3, 4)
    return (jnp.concatenate([out[0], out[1]], axis=1),)


if __name__ == "__main__":
    key = jax.random.PRNGKey(0)
    k_x1, k_x2, k_w, k_b = jax.random.split(key, 4)

    N, Cin, H, W, Cout = 1, 2, 4, 4, 3
    x1 = jax.random.normal(k_x1, (N, Cin, H, W), dtype=jnp.float32)
    x2 = jax.random.normal(k_x2, (N, Cin, H, W), dtype=jnp.float32)

    # Conv2d(2, 3, 1) parameters: weight (Cout, Cin, 1, 1) -> (Cout, Cin).
    w_conv = jax.random.normal(k_w, (Cout, Cin, 1, 1), dtype=jnp.float32) * 0.5
    w = w_conv.reshape(Cout, Cin)
    # Conv bias: only used by the reference — it cancels exactly under the
    # training-mode BatchNorm mean subtraction, so the kernel omits it.
    b = jax.random.normal(k_b, (Cout,), dtype=jnp.float32) * 0.1

    # BatchNorm2d(3) default init: gamma=1, beta=0.
    gamma = jnp.ones((Cout,), dtype=jnp.float32)
    beta = jnp.zeros((Cout,), dtype=jnp.float32)

    (out,) = model_forward(x1, x2, w, gamma, beta)
    out = jax.block_until_ready(out)

    # Pure-JAX reference (includes the conv bias, matching PyTorch exactly).
    def ref_one(x):
        y = jnp.einsum("nchw,dc->ndhw", x, w) + b.reshape(1, Cout, 1, 1)
        m = jnp.mean(y, axis=(0, 2, 3), keepdims=True)
        v = jnp.mean((y - m) ** 2, axis=(0, 2, 3), keepdims=True)
        return ((y - m) / jnp.sqrt(v + EPS) * gamma.reshape(1, Cout, 1, 1)
                + beta.reshape(1, Cout, 1, 1))

    ref = jnp.concatenate([ref_one(x1), ref_one(x2)], axis=1)
    assert out.shape == (N, 2 * Cout, H, W), out.shape
    assert jnp.allclose(out, ref, atol=1e-4, rtol=1e-4), float(
        jnp.max(jnp.abs(out - ref)))

    print("KERNEL_OK")
</pallas_src>

<mosaic_0001>
module attributes {stable_mosaic.version = 11 : i64} {
  func.func @conv_bn_kernel(%arg0: memref<2x16xf32, #tpu.memory_space<vmem>>, %arg1: memref<2x16xf32, #tpu.memory_space<vmem>>, %arg2: memref<3x2xf32, #tpu.memory_space<vmem>>, %arg3: memref<3x1xf32, #tpu.memory_space<vmem>>, %arg4: memref<3x1xf32, #tpu.memory_space<vmem>>, %arg5: memref<6x16xf32, #tpu.memory_space<vmem>>) attributes {dimension_semantics = [], scalar_prefetch = 0 : i64, scratch_operands = 0 : i64, tpu.core_type = #tpu.core_type<tc>} {
    %c0 = arith.constant 0 : index
    %c0_0 = arith.constant 0 : index
    %0 = vector.load %arg2[%c0, %c0_0] : memref<3x2xf32, #tpu.memory_space<vmem>>, vector<3x1xf32>
    %c0_1 = arith.constant 0 : index
    %c0_2 = arith.constant 0 : index
    %1 = vector.load %arg0[%c0_1, %c0_2] : memref<2x16xf32, #tpu.memory_space<vmem>>, vector<1x16xf32>
    %2 = vector.broadcast %0 : vector<3x1xf32> to vector<3x16xf32>
    %3 = vector.broadcast %1 : vector<1x16xf32> to vector<3x16xf32>
    %4 = arith.mulf %2, %3 : vector<3x16xf32>
    %c0_3 = arith.constant 0 : index
    %c1 = arith.constant 1 : index
    %5 = vector.load %arg2[%c0_3, %c1] : memref<3x2xf32, #tpu.memory_space<vmem>>, vector<3x1xf32>
    %c1_4 = arith.constant 1 : index
    %c0_5 = arith.constant 0 : index
    %6 = vector.load %arg0[%c1_4, %c0_5] : memref<2x16xf32, #tpu.memory_space<vmem>>, vector<1x16xf32>
    %7 = vector.broadcast %5 : vector<3x1xf32> to vector<3x16xf32>
    %8 = vector.broadcast %6 : vector<1x16xf32> to vector<3x16xf32>
    %9 = arith.mulf %7, %8 : vector<3x16xf32>
    %10 = arith.addf %4, %9 : vector<3x16xf32>
    %c0_6 = arith.constant 0 : index
    %c0_7 = arith.constant 0 : index
    %11 = vector.load %arg2[%c0_6, %c0_7] : memref<3x2xf32, #tpu.memory_space<vmem>>, vector<3x1xf32>
    %c0_8 = arith.constant 0 : index
    %c0_9 = arith.constant 0 : index
    %12 = vector.load %arg1[%c0_8, %c0_9] : memref<2x16xf32, #tpu.memory_space<vmem>>, vector<1x16xf32>
    %13 = vector.broadcast %11 : vector<3x1xf32> to vector<3x16xf32>
    %14 = vector.broadcast %12 : vector<1x16xf32> to vector<3x16xf32>
    %15 = arith.mulf %13, %14 : vector<3x16xf32>
    %c0_10 = arith.constant 0 : index
    %c1_11 = arith.constant 1 : index
    %16 = vector.load %arg2[%c0_10, %c1_11] : memref<3x2xf32, #tpu.memory_space<vmem>>, vector<3x1xf32>
    %c1_12 = arith.constant 1 : index
    %c0_13 = arith.constant 0 : index
    %17 = vector.load %arg1[%c1_12, %c0_13] : memref<2x16xf32, #tpu.memory_space<vmem>>, vector<1x16xf32>
    %18 = vector.broadcast %16 : vector<3x1xf32> to vector<3x16xf32>
    %19 = vector.broadcast %17 : vector<1x16xf32> to vector<3x16xf32>
    %20 = arith.mulf %18, %19 : vector<3x16xf32>
    %21 = arith.addf %15, %20 : vector<3x16xf32>
    %22 = tpu.concatenate %10, %21 in 0 : vector<3x16xf32>, vector<3x16xf32> -> vector<6x16xf32>
    %23 = arith.mulf %22, %22 : vector<6x16xf32>
    %24 = tpu.concatenate %22, %23 in 0 : vector<6x16xf32>, vector<6x16xf32> -> vector<12x16xf32>
    %cst = arith.constant dense<0.000000e+00> : vector<12xf32>
    %25 = vector.multi_reduction <add>, %24, %cst [1] : vector<12x16xf32> to vector<12xf32>
    %26 = vector.shape_cast %25 : vector<12xf32> to vector<12x1xf32>
    %27 = vector.extract_strided_slice %26 {offsets = [0, 0], sizes = [6, 1], strides = [1, 1]} : vector<12x1xf32> to vector<6x1xf32>
    %cst_14 = arith.constant 6.250000e-02 : f32
    %28 = vector.broadcast %cst_14 : f32 to vector<6x1xf32>
    %29 = arith.mulf %27, %28 : vector<6x1xf32>
    %30 = vector.extract_strided_slice %26 {offsets = [6, 0], sizes = [6, 1], strides = [1, 1]} : vector<12x1xf32> to vector<6x1xf32>
    %cst_15 = arith.constant 6.250000e-02 : f32
    %31 = vector.broadcast %cst_15 : f32 to vector<6x1xf32>
    %32 = arith.mulf %30, %31 : vector<6x1xf32>
    %33 = arith.mulf %29, %29 : vector<6x1xf32>
    %34 = arith.subf %32, %33 : vector<6x1xf32>
    %cst_16 = arith.constant 0.000000e+00 : f32
    %35 = vector.broadcast %cst_16 : f32 to vector<6x1xf32>
    %36 = arith.maximumf %34, %35 : vector<6x1xf32>
    %c0_17 = arith.constant 0 : index
    %c0_18 = arith.constant 0 : index
    %37 = vector.load %arg3[%c0_17, %c0_18] : memref<3x1xf32, #tpu.memory_space<vmem>>, vector<3x1xf32>
    %c0_19 = arith.constant 0 : index
    %c0_20 = arith.constant 0 : index
    %38 = vector.load %arg3[%c0_19, %c0_20] : memref<3x1xf32, #tpu.memory_space<vmem>>, vector<3x1xf32>
    %39 = tpu.concatenate %37, %38 in 0 : vector<3x1xf32>, vector<3x1xf32> -> vector<6x1xf32>
    %c0_21 = arith.constant 0 : index
    %c0_22 = arith.constant 0 : index
    %40 = vector.load %arg4[%c0_21, %c0_22] : memref<3x1xf32, #tpu.memory_space<vmem>>, vector<3x1xf32>
    %c0_23 = arith.constant 0 : index
    %c0_24 = arith.constant 0 : index
    %41 = vector.load %arg4[%c0_23, %c0_24] : memref<3x1xf32, #tpu.memory_space<vmem>>, vector<3x1xf32>
    %42 = tpu.concatenate %40, %41 in 0 : vector<3x1xf32>, vector<3x1xf32> -> vector<6x1xf32>
    %cst_25 = arith.constant 9.99999974E-6 : f32
    %43 = vector.broadcast %cst_25 : f32 to vector<6x1xf32>
    %44 = arith.addf %36, %43 : vector<6x1xf32>
    %45 = math.rsqrt %44 : vector<6x1xf32>
    %46 = arith.mulf %45, %39 : vector<6x1xf32>
    %47 = vector.broadcast %29 : vector<6x1xf32> to vector<6x16xf32>
    %48 = arith.subf %22, %47 : vector<6x16xf32>
    %49 = vector.broadcast %46 : vector<6x1xf32> to vector<6x16xf32>
    %50 = arith.mulf %48, %49 : vector<6x16xf32>
    %51 = vector.broadcast %42 : vector<6x1xf32> to vector<6x16xf32>
    %52 = arith.addf %50, %51 : vector<6x16xf32>
    %c0_26 = arith.constant 0 : index
    %c0_27 = arith.constant 0 : index
    %53 = vector.load %arg5[%c0_26, %c0_27] : memref<6x16xf32, #tpu.memory_space<vmem>>, vector<6x16xf32>
    tpu.vector_store %arg5[%c0_26, %c0_27], %52 {strides = array<i32>} : memref<6x16xf32, #tpu.memory_space<vmem>>, vector<6x16xf32>,
    return
  }
}

</mosaic_0001>

<bundles_post_ra>
// kernel: tpu_custom_call.1
= control target key start
LH: loop header
LB: loop body
LE: loop exit
PB: predicated region body
PF: predicated region fallthrough
CT: control target
= control target key end

     0   :  { %v179_v1 = vmov 0   ;;  %s239_s0 = inlined_call_operand.vmem [shape: f32[2,16], index: 0, kind: input, shape index: {}]   ;;  %s240_s1 = inlined_call_operand.vmem [shape: f32[2,16], index: 1, kind: input, shape index: {}]   ;;  %s241_s2 = inlined_call_operand.vmem [shape: f32[3,2], index: 2, kind: input, shape index: {}]   ;;  %s242_s3 = inlined_call_operand.vmem [shape: f32[3,1], index: 3, kind: input, shape index: {}]   ;;  %s243_s4 = inlined_call_operand.vmem [shape: f32[3,1], index: 4, kind: input, shape index: {}]   ;;  %s244_s5 = inlined_call_operand.hbm [shape: f32[6,16], index: 5, kind: output, shape index: {}]  }
   0x1   :  { %v21_v0 = vld [vmem:[%s241_s2] sm:$0x7]  ;;  %149 = vset.pattern.permute.xlu0 %v179_v1  ;;  %151 = vset.pattern.permute.xlu1 %v179_v1 }
   0x2   :  { %25 = vperm.xlu0 %149, %v21_v0  }
   0x3   :  { %10 = vsyncpa [#allocation3], 0  ;;  %v180_v2 = vmov 1   ;;  %v144_v4 = vld [vmem:[%s240_s1] ss:$0 sm:$0xff]  ;;  %vm60_vm0 = vcmask 1042432  }
   0x4   :  { %v143_v5 = vld [vmem:[%s239_s0 + $0x1] ss:$0 sm:$0xff]  ;;  %v142_v7 = vld [vmem:[%s239_s0] ss:$0 sm:$0xff]  ;;  %vm66_vm1 = vcmask 1045504   ;;  %vm68_vm2 = vcmask 130048  }
   0x5   :  { %v145_v6 = vld [vmem:[%s240_s1 + $0x1] ss:$0 sm:$0xff]  ;;  %vm72_vm3 = vcmask 125952   ;;  %vm114_vm4 = vcmask 1041408   ;;  %vm126_vm5 = vcmask 128000  }
   0x6   :  { %150 = vset.pattern.permute.xlu0 %v180_v2  ;;  %v86_v34 = vld [vmem:[%s242_s3] sm:$0x7]  ;;  %s181_s3 = smov [#allocation2]  }
   0x7   :  { %35 = vperm.xlu0 %150, %v21_v0   ;;  %v88_v35 = vrot.slane %v86_v34, 5  ;;  %v91_v38 = vld [vmem:[%s243_s4] sm:$0x7]  ;;  %s134_s29 = sshll.u32 %s181_s3, 4  ;;  %s135_s29 = int_to_ptr.vmem [resolvable:$true] %s134_s29 }
   0x8   :  { %v93_v42 = vrot.slane %v91_v38, 5  ;;  %s157_s4 = scalar_lea.vmem %s135_s29, 128  ;;  %p162_p1 = scmp.lt.s32.totalorder %s135_s29, %s135_s29 }
   0x9   :  { %v90_v36 = vsel %vm60_vm0, %v86_v34, %v88_v35  ;;  %p158_p0 = scmp.ne.s32.totalorder %s135_s29, %s157_s4  ;;  %p163_p2 = scmp.lt.s32.totalorder %s157_s4, %s157_s4 }
   0xa   :  { %v101_v37 = vrot.slane %v90_v36, 2  ;;  %v95_v44 = vsel %vm60_vm0, %v91_v38, %v93_v42 }
   0xb   :  { %152 = vset.pattern.permute.xlu0 %v179_v1  ;;  %p164_p3 = por %p163_p2, %p162_p1 }
   0xd   :  { %p165_p4 = pnand %p164_p3, %p158_p0 }
  0x7d   :  { %v26_v3 = vpop.permute.xlu0 %25 }
  0x7e   :  { %v49_v9 = vmul.f32 %v144_v4, %v26_v3  ;;  %v32_v12 = vmul.f32 %v142_v7, %v26_v3 }
  0x82   :  { %v36_v8 = vpop.permute.xlu0 %35 }
  0x83   :  { %v42_v10 = vmul.f32 %v143_v5, %v36_v8  ;;  %v55_v11 = vmul.f32 %v145_v6, %v36_v8 }
  0x85   :  { %v56_v13 = vadd.f32 %v55_v11, %v49_v9  ;;  %v43_v14 = vadd.f32 %v42_v10, %v32_v12 }
  0x87   :  { %v58_v15 = vrot.slane %v56_v13, 5 }
  0x89   :  { %v61_v16 = vsel %vm60_vm0, %v43_v14, %v58_v15 }
  0x8a   :  { %v62_v17 = vmul.f32 %v61_v16, %v61_v16 }
  0x8c   :  { %v64_v18 = vrot.slane %v62_v17, 2 }
  0x8e   :  { %v67_v19 = vsel %vm66_vm1, %v61_v16, %v64_v18  ;;  %v73_v21 = vsel %vm72_vm3, %v64_v18, 0.0 }
  0x8f   :  { %v69_v20 = vsel %vm68_vm2, %v67_v19, 0.0 }
  0x90   :  { %70 = vadd.xlane.f32.xlu1 %v69_v20 }
  0x94   :  { %74 = vadd.xlane.f32.xlu1 %v73_v21 }
 0x119   :  { %v71_v22 = vpop.xlane.xlu1 %70 }
 0x11a   :  { %v76_v23 = vmul.f32 0.0625, %v71_v22 }
 0x11c   :  { %v78_v24 = vmul.f32 %v76_v23, %v76_v23  ;;  %v105_v49 = vsub.f32 %v61_v16, %v76_v23 }
 0x11d   :  { %v75_v25 = vpop.xlane.xlu1 %74 }
 0x11e   :  { %v80_v26 = vrot.slane %v78_v24, 2  ;;  %v77_v27 = vmul.f32 0.0625, %v75_v25 }
 0x120   :  { %v82_v28 = vsub.f32 %v76_v23, %v80_v26  ;;  %v83_v29 = vsub.f32 %v77_v27, %v80_v26 }
 0x122   :  { %v84_v30 = vmax.f32 %v82_v28, 0.0  ;;  %v85_v31 = vmax.f32 %v83_v29, 0.0 }
 0x124   :  { %v96_v32 = vadd.f32 1e-05, %v84_v30  ;;  %v97_v33 = vadd.f32 1e-05, %v85_v31 }
 0x126   :  { %153 = vrsqrt.f32 %v96_v32 }
 0x127   :  { %155 = vrsqrt.f32 %v97_v33 }
 0x133   :  { %v154_v39 = vpop.eup %153 }
 0x134   :  { %v156_v40 = vpop.eup %155  ;;  %v103_v41 = vmul.f32 %v154_v39, %v101_v37 }
 0x135   :  { %v104_v43 = vmul.f32 %v156_v40, %v101_v37 }
 0x136   :  { %108 = vperm.xlu1 %151, %v103_v41  }
 0x137   :  { %112 = vperm.xlu0 %152, %v104_v43  }
 0x13b   :  { %122 = vperm.xlu0 %152, %v95_v44  }
 0x1b1   :  { %v109_v45 = vpop.permute.xlu1 %108 }
 0x1b2   :  { %v113_v46 = vpop.permute.xlu0 %112  ;;  %v115_v47 = vrot.slane %v109_v45, 6 }
 0x1b3   :  { %v116_v48 = vrot.slane %v113_v46, 6 }
 0x1b5   :  { %v117_v50 = vsel %vm114_vm4, %v115_v47, %v116_v48 }
 0x1b6   :  { %v123_v51 = vpop.permute.xlu0 %122  ;;  %v119_v52 = vmul.f32 %v117_v50, %v105_v49 }
 0x1b8   :  { %v125_v53 = vadd.f32 %v123_v51, %v119_v52 }
 0x1ba   :  { %127 = vst.msk [vmem:[#allocation2] sm:$0x3f] %vm126_vm5, %v125_v53 }
 0x1bb   :  { %168 = shalt.err (!%p165_p4)
}
 0x1bc   :  { %137 = dma.vmem_to_hbm [thread:$0]  %s135_s29, 128, %s244_s5, [#allocation3]  }
 0x1bd   :  { %177 = dma.done.wait [#allocation3], 128  }
 0x1be   :  { %178 = vsyncadd [#allocation3], 4294967168 }
 0x1bf   :  { %141 = vsyncpa [#allocation3], 1 }

</bundles_post_ra>
